<compile_context>
chip_gen: v5e
topology: v5e:2x2
jax: 0.10.0
libtpu: 0.0.40
codegen_flags: <defaults>
</compile_context>

<pallas_src>
import functools

import jax
import jax.numpy as jnp
from jax.experimental import pallas as pl
from jax.experimental.pallas import tpu as pltpu

_MIB = 1024 * 1024
_LANE = 128


def _round_up(x, m):
    return (x + m - 1) // m * m


def _vmem_capacity_bytes():
    """Per-TensorCore VMEM capacity; conservative fallback if query fails."""
    try:
        return int(pltpu.get_tpu_info().vmem_capacity_bytes)
    except Exception:
        return 64 * _MIB  # v7x per-TC capacity (smallest of v5e/v6e/v7x)


# --------------------------------------------------------------------------- #
# Kernel
# --------------------------------------------------------------------------- #
def _make_mlp_kernel(n_layers):
    """Fused forward over all layers.

    Ref layout after x_ref: (w_i, shift_i) for every layer i, then the output.
      * hidden layer:  w = (0.5*bn_scale) * W^T  (bf16),
                       shift = 0.5*(bn_shift + bias*bn_scale)  (f32)
                       y = x @ w + shift ;  h = 0.5*tanh(y) + 0.5   (= sigmoid)
      * last layer:    w = W^T (bf16), shift = bias (f32), no activation.
    Padded lanes carry zero weights/shift, so padded hidden activations (0.5)
    are killed by the zero rows of the next layer's weight.
    """

    def kernel(x_ref, *refs):
        o_ref = refs[-1]
        h = x_ref[...]  # f32 activations throughout
        for i in range(n_layers):
            w_ref = refs[2 * i]
            s_ref = refs[2 * i + 1]
            # MXU matmul (bf16 feeds, f32 accumulate) + folded shift/bias (VPU)
            y = jnp.dot(h.astype(w_ref.dtype), w_ref[...],
                        preferred_element_type=jnp.float32) + s_ref[...]
            if i < n_layers - 1:
                # exact sigmoid via a single EUP tanh (the 1/2 inside tanh is
                # already folded into w/shift at prep time)
                h = 0.5 * jnp.tanh(y) + 0.5
            else:
                h = y
        o_ref[...] = h.astype(o_ref.dtype)

    return kernel


# --------------------------------------------------------------------------- #
# Parameter preparation (one-time, outside the hot path)
# --------------------------------------------------------------------------- #
def init_mlp_params(key, layer_sizes):
    """Deterministic synthetic parameters matching the PyTorch module shapes."""
    params = []
    n_layers = len(layer_sizes) - 1
    for i in range(n_layers):
        fan_in, fan_out = layer_sizes[i], layer_sizes[i + 1]
        key, kw, kb = jax.random.split(key, 3)
        bound = 1.0 / jnp.sqrt(fan_in)
        # nn.Linear: weight (out, in), bias (out,)
        w = jax.random.uniform(kw, (fan_out, fan_in), jnp.float32, -bound, bound)
        b = jax.random.uniform(kb, (fan_out,), jnp.float32, -bound, bound)
        layer = {"w": w, "b": b}
        if i < n_layers - 1:
            # nn.BatchNorm1d(fan_out): gamma=1, beta=0, mean=0, var=1 (fresh module)
            layer["gamma"] = jnp.ones((fan_out,), jnp.float32)
            layer["beta"] = jnp.zeros((fan_out,), jnp.float32)
            layer["running_mean"] = jnp.zeros((fan_out,), jnp.float32)
            layer["running_var"] = jnp.ones((fan_out,), jnp.float32)
        params.append(layer)
    return params


def prepare_mlp_params(params, eps=1e-5, param_dtype=jnp.bfloat16, lane=_LANE):
    """Fold BN + bias + the sigmoid's inner 1/2 into the weights; lane-pad.

    Returns (layers, out_features): layers[i] = {"w": (in_pad,out_pad) bf16,
    "shift": (1,out_pad) f32}; out_features = real width of the final output.
    """
    n = len(params)
    layers = []
    prev_out_pad = None
    for i, p in enumerate(params):
        w = jnp.asarray(p["w"], jnp.float32)          # (out, in)  nn.Linear layout
        b = jnp.asarray(p["b"], jnp.float32)
        out, fin = w.shape
        w_t = w.T                                     # (in, out) so kernel does x @ W
        if i < n - 1:
            inv_std = 1.0 / jnp.sqrt(jnp.asarray(p["running_var"], jnp.float32) + eps)
            scale = jnp.asarray(p["gamma"], jnp.float32) * inv_std
            shift = (jnp.asarray(p["beta"], jnp.float32)
                     - jnp.asarray(p["running_mean"], jnp.float32) * scale
                     + b * scale)
            # fold BN scale AND the 1/2 of sigmoid(v)=0.5*tanh(v/2)+0.5
            w_t = w_t * (0.5 * scale)[None, :]
            shift = 0.5 * shift
        else:
            shift = b
        in_pad = fin if i == 0 else prev_out_pad      # match previous padded width
        out_pad = _round_up(out, lane)
        w_p = jnp.zeros((in_pad, out_pad), jnp.float32).at[:fin, :out].set(w_t)
        s_p = jnp.zeros((1, out_pad), jnp.float32).at[0, :out].set(shift)
        layers.append({"w": w_p.astype(param_dtype), "shift": s_p})
        prev_out_pad = out_pad
    out_features = int(params[-1]["w"].shape[0])
    return layers, out_features


# --------------------------------------------------------------------------- #
# Forward wrapper
# --------------------------------------------------------------------------- #
@functools.partial(jax.jit, static_argnames=("out_features", "tile_m", "param_buffers"))
def _mlp_forward(x, layers, *, out_features, tile_m, param_buffers):
    batch, in0 = x.shape
    n_layers = len(layers)
    out_pad = layers[-1]["w"].shape[1]
    max_width = max(in0, max(max(l["w"].shape) for l in layers))

    # ---- flatten params + constant-index (resident) BlockSpecs ----
    flat_params, param_specs = [], []
    for l in layers:
        for name in ("w", "shift"):
            arr = l[name]
            if param_buffers:
                spec = pl.BlockSpec(arr.shape, lambda i: (0, 0),
                                    pipeline_mode=pl.Buffered(param_buffers))
            else:
                spec = pl.BlockSpec(arr.shape, lambda i: (0, 0))
            flat_params.append(arr)
            param_specs.append(spec)

    def _nbytes(a):
        return int(a.size) * a.dtype.itemsize

    # ---- VMEM budgeting (per TensorCore: v7x 64 MiB, v5e/v6e 128 MiB) ----
    cap = _vmem_capacity_bytes()
    budget = cap - 8 * _MIB                                   # leave headroom
    pbuf = param_buffers if param_buffers else 2
    resident = sum(_nbytes(p) for p in flat_params) * pbuf
    if resident > budget - 4 * _MIB:
        # TODO(synk): add a K/N-tiled streaming fallback (accumulator grid axis
        #             or pltpu.emit_pipeline) for models whose resident
        #             parameter set exceeds per-core VMEM.
        raise ValueError(
            f"resident parameters ({resident} B) exceed VMEM budget ({budget} B)")

    tm = min(tile_m, batch)

    def _stream_bytes(t):
        return (2 * t * in0 * x.dtype.itemsize   # x tile (double-buffered)
                + 2 * t * out_pad * 4            # out tile (double-buffered)
                + 4 * t * max_width * 4)         # h/y temporaries (headroom)

    while tm > 8 and resident + _stream_bytes(tm) > budget:
        tm = max(8, tm // 2)
    vmem_limit = int(min(budget, max(32 * _MIB,
                                     resident + _stream_bytes(tm) + 4 * _MIB)))

    grid = (pl.cdiv(batch, tm),)
    in_specs = [pl.BlockSpec((tm, in0), lambda i: (i, 0))] + param_specs
    out_spec = pl.BlockSpec((tm, out_pad), lambda i: (i, 0))

    flops = 2 * batch * sum(l["w"].shape[0] * l["w"].shape[1] for l in layers)
    transcendentals = batch * sum(l["w"].shape[1] for l in layers[:-1])
    bytes_accessed = (_nbytes(x) + sum(_nbytes(p) for p in flat_params)
                      + batch * out_pad * 4)

    out = pl.pallas_call(
        _make_mlp_kernel(n_layers),
        out_shape=jax.ShapeDtypeStruct((batch, out_pad), jnp.float32),
        grid=grid,
        in_specs=in_specs,
        out_specs=out_spec,
        compiler_params=pltpu.CompilerParams(
            dimension_semantics=("parallel",),   # batch tiles across TCs on v7x
            vmem_limit_bytes=vmem_limit,
        ),
        cost_estimate=pl.CostEstimate(
            flops=flops,
            transcendentals=transcendentals,
            bytes_accessed=bytes_accessed),
    )(x, *flat_params)

    # lane-dense kernel output -> slice back to the real feature count
    return out[:, :out_features]


def mlp_forward(x, layers, *, out_features, tile_m=512):
    """Fused MLP forward; prefers single-buffered resident params."""
    try:
        return _mlp_forward(x, layers, out_features=out_features,
                            tile_m=tile_m, param_buffers=1)
    except Exception:
        # pipeline_mode=pl.Buffered(1) not available on this jax build (or the
        # single-buffer path failed) -> fall back to default double buffering.
        return _mlp_forward(x, layers, out_features=out_features,
                            tile_m=tile_m, param_buffers=0)


# --------------------------------------------------------------------------- #
# Pure-JAX reference (eval-mode BN), for correctness checking
# --------------------------------------------------------------------------- #
def mlp_reference(x, params, eps=1e-5):
    n = len(params)
    h = x
    for i, p in enumerate(params):
        h = jnp.dot(h, p["w"].T, precision=jax.lax.Precision.HIGHEST) + p["b"]
        if i < n - 1:
            h = (h - p["running_mean"]) / jnp.sqrt(p["running_var"] + eps)
            h = p["gamma"] * h + p["beta"]
            h = jax.nn.sigmoid(h)
    return h


if __name__ == "__main__":
    layer_sizes = [16, 32, 32, 8]
    batch = 8

    key = jax.random.PRNGKey(0)
    key, kx = jax.random.split(key)
    x = jax.random.normal(kx, (batch, layer_sizes[0]), jnp.float32)

    params = init_mlp_params(key, layer_sizes)
    layers, out_features = prepare_mlp_params(params)   # bf16 MXU feeds

    y = mlp_forward(x, layers, out_features=out_features)
    jax.block_until_ready(y)

    assert y.shape == (batch, layer_sizes[-1]), y.shape

    y_ref = mlp_reference(x, params)
    # Tolerance dominated by the intentional bf16 weight/activation MXU feeds;
    # the sigmoid itself is exact (single tanh, no approx reciprocal).
    max_err = float(jnp.max(jnp.abs(y - y_ref)))
    assert jnp.allclose(y, y_ref, atol=2e-2, rtol=2e-2), max_err

    print("KERNEL_OK")
</pallas_src>

<mosaic_0001>
module attributes {stable_mosaic.version = 11 : i64} {
  func.func @kernel(%arg0: i32, %arg1: memref<8x16xf32, #tpu.memory_space<vmem>>, %arg2: memref<16x128xbf16, #tpu.memory_space<vmem>>, %arg3: memref<1x128xf32, #tpu.memory_space<vmem>>, %arg4: memref<128x128xbf16, #tpu.memory_space<vmem>>, %arg5: memref<1x128xf32, #tpu.memory_space<vmem>>, %arg6: memref<128x128xbf16, #tpu.memory_space<vmem>>, %arg7: memref<1x128xf32, #tpu.memory_space<vmem>>, %arg8: memref<8x128xf32, #tpu.memory_space<vmem>>) attributes {dimension_semantics = [#tpu.dimension_semantics<parallel>], iteration_bounds = array<i64: 1>, scalar_prefetch = 0 : i64, scratch_operands = 0 : i64, tpu.core_type = #tpu.core_type<tc>, window_params = [{transform_indices = @transform_0, window_bounds = array<i64: 8, 16>}, {pipeline_mode = #tpu.pipeline_mode<synchronous>, transform_indices = @transform_1, window_bounds = array<i64: 16, 128>}, {pipeline_mode = #tpu.pipeline_mode<synchronous>, transform_indices = @transform_2, window_bounds = array<i64: 1, 128>}, {pipeline_mode = #tpu.pipeline_mode<synchronous>, transform_indices = @transform_3, window_bounds = array<i64: 128, 128>}, {pipeline_mode = #tpu.pipeline_mode<synchronous>, transform_indices = @transform_4, window_bounds = array<i64: 1, 128>}, {pipeline_mode = #tpu.pipeline_mode<synchronous>, transform_indices = @transform_5, window_bounds = array<i64: 128, 128>}, {pipeline_mode = #tpu.pipeline_mode<synchronous>, transform_indices = @transform_6, window_bounds = array<i64: 1, 128>}, {transform_indices = @transform_7, window_bounds = array<i64: 8, 128>}]} {
    %c0 = arith.constant 0 : index
    %c0_0 = arith.constant 0 : index
    %0 = vector.load %arg1[%c0, %c0_0] : memref<8x16xf32, #tpu.memory_space<vmem>>, vector<8x16xf32>
    %1 = arith.truncf %0 : vector<8x16xf32> to vector<8x16xbf16>
    %c0_1 = arith.constant 0 : index
    %c0_2 = arith.constant 0 : index
    %2 = vector.load %arg2[%c0_1, %c0_2] : memref<16x128xbf16, #tpu.memory_space<vmem>>, vector<16x128xbf16>
    %cst = arith.constant dense<0.000000e+00> : vector<8x128xf32>
    %3 = tpu.matmul %1, %2, %cst {dimension_numbers = #tpu.dot_dimension_numbers<[1], [0], [0], [1], [0, 0, 1, 1], [], []>} : vector<8x16xbf16>, vector<16x128xbf16>, vector<8x128xf32> -> vector<8x128xf32>
    %c0_3 = arith.constant 0 : index
    %c0_4 = arith.constant 0 : index
    %4 = vector.load %arg3[%c0_3, %c0_4] : memref<1x128xf32, #tpu.memory_space<vmem>>, vector<1x128xf32>
    %5 = vector.broadcast %4 : vector<1x128xf32> to vector<8x128xf32>
    %6 = arith.addf %3, %5 : vector<8x128xf32>
    %7 = math.tanh %6 : vector<8x128xf32>
    %cst_5 = arith.constant 5.000000e-01 : f32
    %8 = vector.broadcast %cst_5 : f32 to vector<8x128xf32>
    %9 = arith.mulf %8, %7 : vector<8x128xf32>
    %cst_6 = arith.constant 5.000000e-01 : f32
    %10 = vector.broadcast %cst_6 : f32 to vector<8x128xf32>
    %11 = arith.addf %9, %10 : vector<8x128xf32>
    %12 = arith.truncf %11 : vector<8x128xf32> to vector<8x128xbf16>
    %c0_7 = arith.constant 0 : index
    %c0_8 = arith.constant 0 : index
    %13 = vector.load %arg4[%c0_7, %c0_8] : memref<128x128xbf16, #tpu.memory_space<vmem>>, vector<128x128xbf16>
    %cst_9 = arith.constant dense<0.000000e+00> : vector<8x128xf32>
    %14 = tpu.matmul %12, %13, %cst_9 {dimension_numbers = #tpu.dot_dimension_numbers<[1], [0], [0], [1], [0, 0, 1, 1], [], []>} : vector<8x128xbf16>, vector<128x128xbf16>, vector<8x128xf32> -> vector<8x128xf32>
    %c0_10 = arith.constant 0 : index
    %c0_11 = arith.constant 0 : index
    %15 = vector.load %arg5[%c0_10, %c0_11] : memref<1x128xf32, #tpu.memory_space<vmem>>, vector<1x128xf32>
    %16 = vector.broadcast %15 : vector<1x128xf32> to vector<8x128xf32>
    %17 = arith.addf %14, %16 : vector<8x128xf32>
    %18 = math.tanh %17 : vector<8x128xf32>
    %cst_12 = arith.constant 5.000000e-01 : f32
    %19 = vector.broadcast %cst_12 : f32 to vector<8x128xf32>
    %20 = arith.mulf %19, %18 : vector<8x128xf32>
    %cst_13 = arith.constant 5.000000e-01 : f32
    %21 = vector.broadcast %cst_13 : f32 to vector<8x128xf32>
    %22 = arith.addf %20, %21 : vector<8x128xf32>
    %23 = arith.truncf %22 : vector<8x128xf32> to vector<8x128xbf16>
    %c0_14 = arith.constant 0 : index
    %c0_15 = arith.constant 0 : index
    %24 = vector.load %arg6[%c0_14, %c0_15] : memref<128x128xbf16, #tpu.memory_space<vmem>>, vector<128x128xbf16>
    %cst_16 = arith.constant dense<0.000000e+00> : vector<8x128xf32>
    %25 = tpu.matmul %23, %24, %cst_16 {dimension_numbers = #tpu.dot_dimension_numbers<[1], [0], [0], [1], [0, 0, 1, 1], [], []>} : vector<8x128xbf16>, vector<128x128xbf16>, vector<8x128xf32> -> vector<8x128xf32>
    %c0_17 = arith.constant 0 : index
    %c0_18 = arith.constant 0 : index
    %26 = vector.load %arg7[%c0_17, %c0_18] : memref<1x128xf32, #tpu.memory_space<vmem>>, vector<1x128xf32>
    %27 = vector.broadcast %26 : vector<1x128xf32> to vector<8x128xf32>
    %28 = arith.addf %25, %27 : vector<8x128xf32>
    %c0_19 = arith.constant 0 : index
    %c0_20 = arith.constant 0 : index
    %29 = vector.load %arg8[%c0_19, %c0_20] : memref<8x128xf32, #tpu.memory_space<vmem>>, vector<8x128xf32>
    tpu.vector_store %arg8[%c0_19, %c0_20], %28 {strides = array<i32>} : memref<8x128xf32, #tpu.memory_space<vmem>>, vector<8x128xf32>,
    return
  }
  func.func @transform_0(%arg0: i32) -> (i32, i32) {
    %c0_i32 = arith.constant 0 : i32
    %c0_i32_0 = arith.constant 0 : i32
    return %arg0, %c0_i32 : i32, i32
  }
  func.func @transform_1(%arg0: i32) -> (i32, i32) {
    %c0_i32 = arith.constant 0 : i32
    %c0_i32_0 = arith.constant 0 : i32
    %c0_i32_1 = arith.constant 0 : i32
    return %c0_i32, %c0_i32_0 : i32, i32
  }
  func.func @transform_2(%arg0: i32) -> (i32, i32) {
    %c0_i32 = arith.constant 0 : i32
    %c0_i32_0 = arith.constant 0 : i32
    %c0_i32_1 = arith.constant 0 : i32
    return %c0_i32, %c0_i32_0 : i32, i32
  }
  func.func @transform_3(%arg0: i32) -> (i32, i32) {
    %c0_i32 = arith.constant 0 : i32
    %c0_i32_0 = arith.constant 0 : i32
    %c0_i32_1 = arith.constant 0 : i32
    return %c0_i32, %c0_i32_0 : i32, i32
  }
  func.func @transform_4(%arg0: i32) -> (i32, i32) {
    %c0_i32 = arith.constant 0 : i32
    %c0_i32_0 = arith.constant 0 : i32
    %c0_i32_1 = arith.constant 0 : i32
    return %c0_i32, %c0_i32_0 : i32, i32
  }
  func.func @transform_5(%arg0: i32) -> (i32, i32) {
    %c0_i32 = arith.constant 0 : i32
    %c0_i32_0 = arith.constant 0 : i32
    %c0_i32_1 = arith.constant 0 : i32
    return %c0_i32, %c0_i32_0 : i32, i32
  }
  func.func @transform_6(%arg0: i32) -> (i32, i32) {
    %c0_i32 = arith.constant 0 : i32
    %c0_i32_0 = arith.constant 0 : i32
    %c0_i32_1 = arith.constant 0 : i32
    return %c0_i32, %c0_i32_0 : i32, i32
  }
  func.func @transform_7(%arg0: i32) -> (i32, i32) {
    %c0_i32 = arith.constant 0 : i32
    %c0_i32_0 = arith.constant 0 : i32
    return %arg0, %c0_i32 : i32, i32
  }
}

module attributes {stable_mosaic.version = 11 : i64} {
  func.func @kernel(%arg0: i32, %arg1: memref<8x16xf32, #tpu.memory_space<vmem>>, %arg2: memref<16x128xbf16, #tpu.memory_space<vmem>>, %arg3: memref<1x128xf32, #tpu.memory_space<vmem>>, %arg4: memref<128x128xbf16, #tpu.memory_space<vmem>>, %arg5: memref<1x128xf32, #tpu.memory_space<vmem>>, %arg6: memref<128x128xbf16, #tpu.memory_space<vmem>>, %arg7: memref<1x128xf32, #tpu.memory_space<vmem>>, %arg8: memref<8x128xf32, #tpu.memory_space<vmem>>) attributes {dimension_semantics = [#tpu.dimension_semantics<parallel>], iteration_bounds = array<i64: 1>, scalar_prefetch = 0 : i64, scratch_operands = 0 : i64, tpu.core_type = #tpu.core_type<tc>, window_params = [{transform_indices = @transform_0, window_bounds = array<i64: 8, 16>}, {pipeline_mode = #tpu.pipeline_mode<synchronous>, transform_indices = @transform_1, window_bounds = array<i64: 16, 128>}, {pipeline_mode = #tpu.pipeline_mode<synchronous>, transform_indices = @transform_2, window_bounds = array<i64: 1, 128>}, {pipeline_mode = #tpu.pipeline_mode<synchronous>, transform_indices = @transform_3, window_bounds = array<i64: 128, 128>}, {pipeline_mode = #tpu.pipeline_mode<synchronous>, transform_indices = @transform_4, window_bounds = array<i64: 1, 128>}, {pipeline_mode = #tpu.pipeline_mode<synchronous>, transform_indices = @transform_5, window_bounds = array<i64: 128, 128>}, {pipeline_mode = #tpu.pipeline_mode<synchronous>, transform_indices = @transform_6, window_bounds = array<i64: 1, 128>}, {transform_indices = @transform_7, window_bounds = array<i64: 8, 128>}]} {
    %c0 = arith.constant 0 : index
    %c0_0 = arith.constant 0 : index
    %0 = vector.load %arg1[%c0, %c0_0] : memref<8x16xf32, #tpu.memory_space<vmem>>, vector<8x16xf32>
    %1 = arith.truncf %0 : vector<8x16xf32> to vector<8x16xbf16>
    %c0_1 = arith.constant 0 : index
    %c0_2 = arith.constant 0 : index
    %2 = vector.load %arg2[%c0_1, %c0_2] : memref<16x128xbf16, #tpu.memory_space<vmem>>, vector<16x128xbf16>
    %cst = arith.constant dense<0.000000e+00> : vector<8x128xf32>
    %3 = tpu.matmul %1, %2, %cst {dimension_numbers = #tpu.dot_dimension_numbers<[1], [0], [0], [1], [0, 0, 1, 1], [], []>} : vector<8x16xbf16>, vector<16x128xbf16>, vector<8x128xf32> -> vector<8x128xf32>
    %c0_3 = arith.constant 0 : index
    %c0_4 = arith.constant 0 : index
    %4 = vector.load %arg3[%c0_3, %c0_4] : memref<1x128xf32, #tpu.memory_space<vmem>>, vector<1x128xf32>
    %5 = vector.broadcast %4 : vector<1x128xf32> to vector<8x128xf32>
    %6 = arith.addf %3, %5 : vector<8x128xf32>
    %7 = math.tanh %6 : vector<8x128xf32>
    %cst_5 = arith.constant 5.000000e-01 : f32
    %8 = vector.broadcast %cst_5 : f32 to vector<8x128xf32>
    %9 = arith.mulf %8, %7 : vector<8x128xf32>
    %cst_6 = arith.constant 5.000000e-01 : f32
    %10 = vector.broadcast %cst_6 : f32 to vector<8x128xf32>
    %11 = arith.addf %9, %10 : vector<8x128xf32>
    %12 = arith.truncf %11 : vector<8x128xf32> to vector<8x128xbf16>
    %c0_7 = arith.constant 0 : index
    %c0_8 = arith.constant 0 : index
    %13 = vector.load %arg4[%c0_7, %c0_8] : memref<128x128xbf16, #tpu.memory_space<vmem>>, vector<128x128xbf16>
    %cst_9 = arith.constant dense<0.000000e+00> : vector<8x128xf32>
    %14 = tpu.matmul %12, %13, %cst_9 {dimension_numbers = #tpu.dot_dimension_numbers<[1], [0], [0], [1], [0, 0, 1, 1], [], []>} : vector<8x128xbf16>, vector<128x128xbf16>, vector<8x128xf32> -> vector<8x128xf32>
    %c0_10 = arith.constant 0 : index
    %c0_11 = arith.constant 0 : index
    %15 = vector.load %arg5[%c0_10, %c0_11] : memref<1x128xf32, #tpu.memory_space<vmem>>, vector<1x128xf32>
    %16 = vector.broadcast %15 : vector<1x128xf32> to vector<8x128xf32>
    %17 = arith.addf %14, %16 : vector<8x128xf32>
    %18 = math.tanh %17 : vector<8x128xf32>
    %cst_12 = arith.constant 5.000000e-01 : f32
    %19 = vector.broadcast %cst_12 : f32 to vector<8x128xf32>
    %20 = arith.mulf %19, %18 : vector<8x128xf32>
    %cst_13 = arith.constant 5.000000e-01 : f32
    %21 = vector.broadcast %cst_13 : f32 to vector<8x128xf32>
    %22 = arith.addf %20, %21 : vector<8x128xf32>
    %23 = arith.truncf %22 : vector<8x128xf32> to vector<8x128xbf16>
    %c0_14 = arith.constant 0 : index
    %c0_15 = arith.constant 0 : index
    %24 = vector.load %arg6[%c0_14, %c0_15] : memref<128x128xbf16, #tpu.memory_space<vmem>>, vector<128x128xbf16>
    %cst_16 = arith.constant dense<0.000000e+00> : vector<8x128xf32>
    %25 = tpu.matmul %23, %24, %cst_16 {dimension_numbers = #tpu.dot_dimension_numbers<[1], [0], [0], [1], [0, 0, 1, 1], [], []>} : vector<8x128xbf16>, vector<128x128xbf16>, vector<8x128xf32> -> vector<8x128xf32>
    %c0_17 = arith.constant 0 : index
    %c0_18 = arith.constant 0 : index
    %26 = vector.load %arg7[%c0_17, %c0_18] : memref<1x128xf32, #tpu.memory_space<vmem>>, vector<1x128xf32>
    %27 = vector.broadcast %26 : vector<1x128xf32> to vector<8x128xf32>
    %28 = arith.addf %25, %27 : vector<8x128xf32>
    %c0_19 = arith.constant 0 : index
    %c0_20 = arith.constant 0 : index
    %29 = vector.load %arg8[%c0_19, %c0_20] : memref<8x128xf32, #tpu.memory_space<vmem>>, vector<8x128xf32>
    tpu.vector_store %arg8[%c0_19, %c0_20], %28 {strides = array<i32>} : memref<8x128xf32, #tpu.memory_space<vmem>>, vector<8x128xf32>,
    return
  }
  func.func @transform_0(%arg0: i32) -> (i32, i32) {
    %c0_i32 = arith.constant 0 : i32
    %c0_i32_0 = arith.constant 0 : i32
    return %arg0, %c0_i32 : i32, i32
  }
  func.func @transform_1(%arg0: i32) -> (i32, i32) {
    %c0_i32 = arith.constant 0 : i32
    %c0_i32_0 = arith.constant 0 : i32
    %c0_i32_1 = arith.constant 0 : i32
    return %c0_i32, %c0_i32_0 : i32, i32
  }
  func.func @transform_2(%arg0: i32) -> (i32, i32) {
    %c0_i32 = arith.constant 0 : i32
    %c0_i32_0 = arith.constant 0 : i32
    %c0_i32_1 = arith.constant 0 : i32
    return %c0_i32, %c0_i32_0 : i32, i32
  }
  func.func @transform_3(%arg0: i32) -> (i32, i32) {
    %c0_i32 = arith.constant 0 : i32
    %c0_i32_0 = arith.constant 0 : i32
    %c0_i32_1 = arith.constant 0 : i32
    return %c0_i32, %c0_i32_0 : i32, i32
  }
  func.func @transform_4(%arg0: i32) -> (i32, i32) {
    %c0_i32 = arith.constant 0 : i32
    %c0_i32_0 = arith.constant 0 : i32
    %c0_i32_1 = arith.constant 0 : i32
    return %c0_i32, %c0_i32_0 : i32, i32
  }
  func.func @transform_5(%arg0: i32) -> (i32, i32) {
    %c0_i32 = arith.constant 0 : i32
    %c0_i32_0 = arith.constant 0 : i32
    %c0_i32_1 = arith.constant 0 : i32
    return %c0_i32, %c0_i32_0 : i32, i32
  }
  func.func @transform_6(%arg0: i32) -> (i32, i32) {
    %c0_i32 = arith.constant 0 : i32
    %c0_i32_0 = arith.constant 0 : i32
    %c0_i32_1 = arith.constant 0 : i32
    return %c0_i32, %c0_i32_0 : i32, i32
  }
  func.func @transform_7(%arg0: i32) -> (i32, i32) {
    %c0_i32 = arith.constant 0 : i32
    %c0_i32_0 = arith.constant 0 : i32
    return %arg0, %c0_i32 : i32, i32
  }
}

</mosaic_0001>

<bundles_post_ra>
// kernel: _mlp_forward.1
= control target key start
LH: loop header
LB: loop body
LE: loop exit
PB: predicated region body
PF: predicated region fallthrough
CT: control target
= control target key end

     0   :  { %12 = vsyncpa [#allocation3], 0  ;;  %s648_s0 = inlined_call_operand.hbm [shape: f32[8,16], index: 0, kind: input, shape index: {}]   ;;  %s649_s1 = inlined_call_operand.hbm [shape: bf16[16,128], index: 1, kind: input, shape index: {}]   ;;  %s650_s2 = inlined_call_operand.hbm [shape: f32[1,128], index: 2, kind: input, shape index: {}]   ;;  %s651_s3 = inlined_call_operand.hbm [shape: bf16[128,128], index: 3, kind: input, shape index: {}]   ;;  %s652_s4 = inlined_call_operand.vmem [shape: f32[1,128], index: 4, kind: input, shape index: {}]   ;;  %s653_s5 = inlined_call_operand.hbm [shape: bf16[128,128], index: 5, kind: input, shape index: {}]   ;;  %s654_s6 = inlined_call_operand.vmem [shape: f32[1,128], index: 6, kind: input, shape index: {}]   ;;  %s655_s7 = inlined_call_operand.hbm [shape: f32[8,128], index: 7, kind: output, shape index: {}]  }
   0x1   :  { %13 = vsyncpa [#allocation6], 0 }
   0x2   :  { %14 = vsyncpa [#allocation9], 0  ;;  %s31_s26 = sshll.u32 %s649_s1, 4  ;;  %s32_s26 = int_to_ptr.hbm [resolvable:$true] %s31_s26 }
   0x3   :  { %15 = vsyncpa [#allocation4], 0  ;;  %s576_s27 = smov [#allocation5]   ;;  %s55_s8 = sshll.u32 %s651_s3, 4  ;;  %s56_s8 = int_to_ptr.hbm [resolvable:$true] %s55_s8 }
   0x4   :  { %s33_s28 = sshll.u32 %s576_s27, 4  ;;  %s577_s9 = smov 64   ;;  %s34_s28 = int_to_ptr.vmem [resolvable:$true] %s33_s28 }
   0x5   :  { %s578_s10 = smov 4   ;;  %s579_s11 = smov [#allocation8]  }
   0x6   :  { %39 = dma.hbm_to_vmem [thread:$0]  %s32_s26, 128, %s34_s28, [#allocation6], %s577_s9, %s577_s9, %s578_s10  }
   0x7   :  { %s57_s12 = sshll.u32 %s579_s11, 4  ;;  %s21_s15 = sshll.u32 %s648_s0, 4  ;;  %s58_s12 = int_to_ptr.vmem [resolvable:$true] %s57_s12  ;;  %s22_s15 = int_to_ptr.hbm [resolvable:$true] %s21_s15 }
   0x8   :  { %63 = dma.hbm_to_vmem [thread:$0]  %s56_s8, 1024, %s58_s12, [#allocation9], %s577_s9, %s577_s9, %s578_s10  }
   0x9   :  { %s45_s17 = sshll.u32 %s650_s2, 4  ;;  %s580_s18 = smov [#allocation2]   ;;  %s46_s17 = int_to_ptr.hbm [resolvable:$true] %s45_s17 }
   0xa   :  { %s23_s19 = sshll.u32 %s580_s18, 4  ;;  %s581_s3 = smov [#allocation7]   ;;  %s24_s19 = int_to_ptr.vmem [resolvable:$true] %s23_s19 }
   0xb   :  { %26 = dma.hbm_to_vmem [thread:$0]  %s22_s15, 128, %s24_s19, [#allocation3]  }
   0xc   :  { %s47_s20 = sshll.u32 %s581_s3, 4  ;;  %s70_s23 = sshll.u32 %s653_s5, 4  ;;  %s48_s20 = int_to_ptr.vmem [resolvable:$true] %s47_s20  ;;  %s71_s23 = int_to_ptr.hbm [resolvable:$true] %s70_s23 }
   0xd   :  { %50 = dma.hbm_to_vmem [thread:$0]  %s46_s17, 16, %s48_s20, [#allocation6]  }
   0xe   :  { %s582_s0 = smov [#allocation10]  }
   0xf   :  { %s72_s24 = sshll.u32 %s582_s0, 4  ;;  %s73_s24 = int_to_ptr.vmem [resolvable:$true] %s72_s24 }
  0x10   :  { %78 = dma.hbm_to_vmem [thread:$0]  %s71_s23, 1024, %s73_s24, [#allocation9], %s577_s9, %s577_s9, %s578_s10  }
  0x11   :  { %568 = dma.done.wait [#allocation3], 128  }
  0x12   :  { %569 = vsyncadd [#allocation3], 4294967168 }
  0x13   :  { %570 = dma.done.wait [#allocation6], 144  }
  0x14   :  { %571 = vsyncadd [#allocation6], 4294967152 }
  0x15   :  { %572 = dma.done.wait [#allocation9], 2048  }
  0x16   :  { %573 = vsyncadd [#allocation9], 4294965248  ;;  %v392_v0 = vld [vmem:[#allocation5] sm:$0xff]  ;;  %v102_v1 = vld [vmem:[#allocation2] sm:$0xff]  ;;  %vm116_vm0 = vcmask 130048   ;;  %s583_s27 = smov [#allocation11]  }
  0x17   :  { %v400_v2 = vld [vmem:[#allocation8 + $0x38] sm:$0xff]  ;;  %v103_v3 = vpack.c.bf16 %v102_v1, %v102_v1  ;;  %127 = vmatpush.bf16.msra.mxu0 %v392_v0  ;;  %v399_v4 = vld [vmem:[#allocation8 + $0x30] sm:$0xff]  ;;  %v398_v5 = vld [vmem:[#allocation8 + $0x28] sm:$0xff]  ;;  %s309_s28 = sshll.u32 %s583_s27, 4  ;;  %s311_s8 = sshll.u32 %s655_s7, 4  ;;  %s310_s28 = int_to_ptr.vmem [resolvable:$true] %s309_s28  ;;  %s312_s8 = int_to_ptr.hbm [resolvable:$true] %s311_s8 }
  0x18   :  { %205 = vmatpush.bf16.msra.mxu1 %v400_v2  ;;  %v397_v6 = vld [vmem:[#allocation8 + $0x20] sm:$0xff]  ;;  %v396_v7 = vld [vmem:[#allocation8 + $0x18] sm:$0xff]  ;;  %v395_v8 = vld [vmem:[#allocation8 + $0x10] sm:$0xff] }
  0x19   :  { %v394_v9 = vld [vmem:[#allocation8 + $0x8] sm:$0xff]  ;;  %v393_v10 = vld [vmem:[#allocation8] sm:$0xff]  ;;  %v408_v11 = vld [vmem:[#allocation10 + $0x38] sm:$0xff] }
  0x1a   :  { %327 = vmatmul.msk.bf16.vlgmr.msra.gmra.mxu0 %vm116_vm0, %v103_v3  ;;  %290 = vmatpush.bf16.msra.mxu2 %v408_v11  ;;  %v407_v12 = vld [vmem:[#allocation10 + $0x30] sm:$0xff]  ;;  %v406_v13 = vld [vmem:[#allocation10 + $0x28] sm:$0xff]  ;;  %v405_v14 = vld [vmem:[#allocation10 + $0x20] sm:$0xff] }
  0x1b   :  { %v417_v15 = vld [vmem:[#allocation7] ss:$0 sm:$0xff]  ;;  %v403_v24 = vld [vmem:[#allocation10 + $0x10] sm:$0xff]  ;;  %v402_v25 = vld [vmem:[#allocation10 + $0x8] sm:$0xff] }
  0x1c   :  { %206 = vmatpush.bf16.msra.mxu1 %v399_v4  ;;  %v404_v23 = vld [vmem:[#allocation10 + $0x18] sm:$0xff]  ;;  %v401_v26 = vld [vmem:[#allocation10] sm:$0xff]  ;;  %v418_v27 = vld [vmem:[%s652_s4] ss:$0 sm:$0xff] }
  0x1d   :  { %v419_v35 = vld [vmem:[%s654_s6] ss:$0 sm:$0xff] }
  0x1e   :  { %291 = vmatpush.bf16.msra.mxu2 %v407_v12 }
  0x20   :  { %207 = vmatpush.bf16.msra.mxu1 %v398_v5 }
  0x22   :  { %292 = vmatpush.bf16.msra.mxu2 %v406_v13 }
  0x24   :  { %208 = vmatpush.bf16.msra.mxu1 %v397_v6 }
  0x26   :  { %293 = vmatpush.bf16.msra.mxu2 %v405_v14 }
  0x28   :  { %209 = vmatpush.bf16.msra.mxu1 %v396_v7 }
  0x2a   :  { %294 = vmatpush.bf16.msra.mxu2 %v404_v23 }
  0x2c   :  { %210 = vmatpush.bf16.msra.mxu1 %v395_v8 }
  0x2e   :  { %295 = vmatpush.bf16.msra.mxu2 %v403_v24 }
  0x30   :  { %211 = vmatpush.bf16.msra.mxu1 %v394_v9 }
  0x32   :  { %296 = vmatpush.bf16.msra.mxu2 %v402_v25 }
  0x34   :  { %212 = vmatpush.bf16.msra.mxu1 %v393_v10 }
  0x36   :  { %297 = vmatpush.bf16.msra.mxu2 %v401_v26 }
  0x97   :  { %v129_v16 = vpop.f32.mrf.mxu0 }
  0x98   :  { %v130_v17 = vadd.f32 %v417_v15, %v129_v16 }
  0x9a   :  { %420 = vtanh.f32 %v130_v17 }
  0x9f   :  { %v131_v18 = vpop.f32.mrf.mxu0 }
  0xa0   :  { %v421_v19 = vpop.eup %420 }
  0xa1   :  { %v134_v20 = vmul.f32 0.5, %v421_v19 }
  0xa3   :  { %v135_v21 = vadd.f32 0.5, %v134_v20 }
  0xa5   :  { %v136_v22 = vpack.c.bf16 %v135_v21, %v135_v21 }
  0xa7   :  { %213 = vmatmul.bf16.vlgmr.msra.gmra.mxu1 %v136_v22 }
 0x124   :  { %v214_v28 = vpop.f32.mrf.mxu1 }
 0x125   :  { %v215_v29 = vadd.f32 %v418_v27, %v214_v28 }
 0x127   :  { %422 = vtanh.f32 %v215_v29 }
 0x12c   :  { %v216_v30 = vpop.f32.mrf.mxu1 }
 0x12d   :  { %v423_v31 = vpop.eup %422 }
 0x12e   :  { %v219_v32 = vmul.f32 0.5, %v423_v31 }
 0x130   :  { %v220_v33 = vadd.f32 0.5, %v219_v32 }
 0x132   :  { %v221_v34 = vpack.c.bf16 %v220_v33, %v220_v33 }
 0x134   :  { %298 = vmatmul.bf16.vlgmr.msra.gmra.mxu2 %v221_v34 }
 0x1b7   :  { %v299_v36 = vpop.f32.mrf.mxu2 }
 0x1b8   :  { %v300_v37 = vadd.f32 %v419_v35, %v299_v36 }
 0x1ba   :  { %303 = vst [vmem:[#allocation11] sm:$0xff] %v300_v37 }
 0x1bb   :  { %314 = dma.vmem_to_hbm [thread:$0]  %s310_s28, 128, %s312_s8, [#allocation4]  }
 0x1bf   :  { %v301_v38 = vpop.f32.mrf.mxu2 }
 0x1c0   :  { %574 = dma.done.wait [#allocation4], 128  }
 0x1c1   :  { %575 = vsyncadd [#allocation4], 4294967168 }
 0x1c2   :  { %319 = vsyncpa [#allocation3], 1 }
 0x1c3   :  { %320 = vsyncpa [#allocation6], 1 }
 0x1c4   :  { %321 = vsyncpa [#allocation9], 1 }
 0x1c5   :  { %322 = vsyncpa [#allocation4], 1 }

// kernel: _mlp_forward.1
= control target key start
LH: loop header
LB: loop body
LE: loop exit
PB: predicated region body
PF: predicated region fallthrough
CT: control target
= control target key end

     0   :  { %12 = vsyncpa [#allocation3], 0  ;;  %s648_s0 = inlined_call_operand.hbm [shape: f32[8,16], index: 0, kind: input, shape index: {}]   ;;  %s649_s1 = inlined_call_operand.hbm [shape: bf16[16,128], index: 1, kind: input, shape index: {}]   ;;  %s650_s2 = inlined_call_operand.hbm [shape: f32[1,128], index: 2, kind: input, shape index: {}]   ;;  %s651_s3 = inlined_call_operand.hbm [shape: bf16[128,128], index: 3, kind: input, shape index: {}]   ;;  %s652_s4 = inlined_call_operand.vmem [shape: f32[1,128], index: 4, kind: input, shape index: {}]   ;;  %s653_s5 = inlined_call_operand.hbm [shape: bf16[128,128], index: 5, kind: input, shape index: {}]   ;;  %s654_s6 = inlined_call_operand.vmem [shape: f32[1,128], index: 6, kind: input, shape index: {}]   ;;  %s655_s7 = inlined_call_operand.hbm [shape: f32[8,128], index: 7, kind: output, shape index: {}]  }
   0x1   :  { %13 = vsyncpa [#allocation6], 0 }
   0x2   :  { %14 = vsyncpa [#allocation9], 0  ;;  %s31_s26 = sshll.u32 %s649_s1, 4  ;;  %s32_s26 = int_to_ptr.hbm [resolvable:$true] %s31_s26 }
   0x3   :  { %15 = vsyncpa [#allocation4], 0  ;;  %s576_s27 = smov [#allocation5]   ;;  %s55_s8 = sshll.u32 %s651_s3, 4  ;;  %s56_s8 = int_to_ptr.hbm [resolvable:$true] %s55_s8 }
   0x4   :  { %s33_s28 = sshll.u32 %s576_s27, 4  ;;  %s577_s9 = smov 64   ;;  %s34_s28 = int_to_ptr.vmem [resolvable:$true] %s33_s28 }
   0x5   :  { %s578_s10 = smov 4   ;;  %s579_s11 = smov [#allocation8]  }
   0x6   :  { %39 = dma.hbm_to_vmem [thread:$0]  %s32_s26, 128, %s34_s28, [#allocation6], %s577_s9, %s577_s9, %s578_s10  }
   0x7   :  { %s57_s12 = sshll.u32 %s579_s11, 4  ;;  %s21_s15 = sshll.u32 %s648_s0, 4  ;;  %s58_s12 = int_to_ptr.vmem [resolvable:$true] %s57_s12  ;;  %s22_s15 = int_to_ptr.hbm [resolvable:$true] %s21_s15 }
   0x8   :  { %63 = dma.hbm_to_vmem [thread:$0]  %s56_s8, 1024, %s58_s12, [#allocation9], %s577_s9, %s577_s9, %s578_s10  }
   0x9   :  { %s45_s17 = sshll.u32 %s650_s2, 4  ;;  %s580_s18 = smov [#allocation2]   ;;  %s46_s17 = int_to_ptr.hbm [resolvable:$true] %s45_s17 }
   0xa   :  { %s23_s19 = sshll.u32 %s580_s18, 4  ;;  %s581_s3 = smov [#allocation7]   ;;  %s24_s19 = int_to_ptr.vmem [resolvable:$true] %s23_s19 }
   0xb   :  { %26 = dma.hbm_to_vmem [thread:$0]  %s22_s15, 128, %s24_s19, [#allocation3]  }
   0xc   :  { %s47_s20 = sshll.u32 %s581_s3, 4  ;;  %s70_s23 = sshll.u32 %s653_s5, 4  ;;  %s48_s20 = int_to_ptr.vmem [resolvable:$true] %s47_s20  ;;  %s71_s23 = int_to_ptr.hbm [resolvable:$true] %s70_s23 }
   0xd   :  { %50 = dma.hbm_to_vmem [thread:$0]  %s46_s17, 16, %s48_s20, [#allocation6]  }
   0xe   :  { %s582_s0 = smov [#allocation10]  }
   0xf   :  { %s72_s24 = sshll.u32 %s582_s0, 4  ;;  %s73_s24 = int_to_ptr.vmem [resolvable:$true] %s72_s24 }
  0x10   :  { %78 = dma.hbm_to_vmem [thread:$0]  %s71_s23, 1024, %s73_s24, [#allocation9], %s577_s9, %s577_s9, %s578_s10  }
  0x11   :  { %568 = dma.done.wait [#allocation3], 128  }
  0x12   :  { %569 = vsyncadd [#allocation3], 4294967168 }
  0x13   :  { %570 = dma.done.wait [#allocation6], 144  }
  0x14   :  { %571 = vsyncadd [#allocation6], 4294967152 }
  0x15   :  { %572 = dma.done.wait [#allocation9], 2048  }
  0x16   :  { %573 = vsyncadd [#allocation9], 4294965248  ;;  %v392_v0 = vld [vmem:[#allocation5] sm:$0xff]  ;;  %v102_v1 = vld [vmem:[#allocation2] sm:$0xff]  ;;  %vm116_vm0 = vcmask 130048   ;;  %s583_s27 = smov [#allocation11]  }
  0x17   :  { %v400_v2 = vld [vmem:[#allocation8 + $0x38] sm:$0xff]  ;;  %v103_v3 = vpack.c.bf16 %v102_v1, %v102_v1  ;;  %127 = vmatpush.bf16.msra.mxu0 %v392_v0  ;;  %v399_v4 = vld [vmem:[#allocation8 + $0x30] sm:$0xff]  ;;  %v398_v5 = vld [vmem:[#allocation8 + $0x28] sm:$0xff]  ;;  %s309_s28 = sshll.u32 %s583_s27, 4  ;;  %s311_s8 = sshll.u32 %s655_s7, 4  ;;  %s310_s28 = int_to_ptr.vmem [resolvable:$true] %s309_s28  ;;  %s312_s8 = int_to_ptr.hbm [resolvable:$true] %s311_s8 }
  0x18   :  { %205 = vmatpush.bf16.msra.mxu1 %v400_v2  ;;  %v397_v6 = vld [vmem:[#allocation8 + $0x20] sm:$0xff]  ;;  %v396_v7 = vld [vmem:[#allocation8 + $0x18] sm:$0xff]  ;;  %v395_v8 = vld [vmem:[#allocation8 + $0x10] sm:$0xff] }
  0x19   :  { %v394_v9 = vld [vmem:[#allocation8 + $0x8] sm:$0xff]  ;;  %v393_v10 = vld [vmem:[#allocation8] sm:$0xff]  ;;  %v408_v11 = vld [vmem:[#allocation10 + $0x38] sm:$0xff] }
  0x1a   :  { %327 = vmatmul.msk.bf16.vlgmr.msra.gmra.mxu0 %vm116_vm0, %v103_v3  ;;  %290 = vmatpush.bf16.msra.mxu2 %v408_v11  ;;  %v407_v12 = vld [vmem:[#allocation10 + $0x30] sm:$0xff]  ;;  %v406_v13 = vld [vmem:[#allocation10 + $0x28] sm:$0xff]  ;;  %v405_v14 = vld [vmem:[#allocation10 + $0x20] sm:$0xff] }
  0x1b   :  { %v417_v15 = vld [vmem:[#allocation7] ss:$0 sm:$0xff]  ;;  %v403_v24 = vld [vmem:[#allocation10 + $0x10] sm:$0xff]  ;;  %v402_v25 = vld [vmem:[#allocation10 + $0x8] sm:$0xff] }
  0x1c   :  { %206 = vmatpush.bf16.msra.mxu1 %v399_v4  ;;  %v404_v23 = vld [vmem:[#allocation10 + $0x18] sm:$0xff]  ;;  %v401_v26 = vld [vmem:[#allocation10] sm:$0xff]  ;;  %v418_v27 = vld [vmem:[%s652_s4] ss:$0 sm:$0xff] }
  0x1d   :  { %v419_v35 = vld [vmem:[%s654_s6] ss:$0 sm:$0xff] }
  0x1e   :  { %291 = vmatpush.bf16.msra.mxu2 %v407_v12 }
  0x20   :  { %207 = vmatpush.bf16.msra.mxu1 %v398_v5 }
  0x22   :  { %292 = vmatpush.bf16.msra.mxu2 %v406_v13 }
  0x24   :  { %208 = vmatpush.bf16.msra.mxu1 %v397_v6 }
  0x26   :  { %293 = vmatpush.bf16.msra.mxu2 %v405_v14 }
  0x28   :  { %209 = vmatpush.bf16.msra.mxu1 %v396_v7 }
  0x2a   :  { %294 = vmatpush.bf16.msra.mxu2 %v404_v23 }
  0x2c   :  { %210 = vmatpush.bf16.msra.mxu1 %v395_v8 }
  0x2e   :  { %295 = vmatpush.bf16.msra.mxu2 %v403_v24 }
  0x30   :  { %211 = vmatpush.bf16.msra.mxu1 %v394_v9 }
  0x32   :  { %296 = vmatpush.bf16.msra.mxu2 %v402_v25 }
  0x34   :  { %212 = vmatpush.bf16.msra.mxu1 %v393_v10 }
  0x36   :  { %297 = vmatpush.bf16.msra.mxu2 %v401_v26 }
  0x97   :  { %v129_v16 = vpop.f32.mrf.mxu0 }
  0x98   :  { %v130_v17 = vadd.f32 %v417_v15, %v129_v16 }
  0x9a   :  { %420 = vtanh.f32 %v130_v17 }
  0x9f   :  { %v131_v18 = vpop.f32.mrf.mxu0 }
  0xa0   :  { %v421_v19 = vpop.eup %420 }
  0xa1   :  { %v134_v20 = vmul.f32 0.5, %v421_v19 }
  0xa3   :  { %v135_v21 = vadd.f32 0.5, %v134_v20 }
  0xa5   :  { %v136_v22 = vpack.c.bf16 %v135_v21, %v135_v21 }
  0xa7   :  { %213 = vmatmul.bf16.vlgmr.msra.gmra.mxu1 %v136_v22 }
 0x124   :  { %v214_v28 = vpop.f32.mrf.mxu1 }
 0x125   :  { %v215_v29 = vadd.f32 %v418_v27, %v214_v28 }
 0x127   :  { %422 = vtanh.f32 %v215_v29 }
 0x12c   :  { %v216_v30 = vpop.f32.mrf.mxu1 }
 0x12d   :  { %v423_v31 = vpop.eup %422 }
 0x12e   :  { %v219_v32 = vmul.f32 0.5, %v423_v31 }
 0x130   :  { %v220_v33 = vadd.f32 0.5, %v219_v32 }
 0x132   :  { %v221_v34 = vpack.c.bf16 %v220_v33, %v220_v33 }
 0x134   :  { %298 = vmatmul.bf16.vlgmr.msra.gmra.mxu2 %v221_v34 }
 0x1b7   :  { %v299_v36 = vpop.f32.mrf.mxu2 }
 0x1b8   :  { %v300_v37 = vadd.f32 %v419_v35, %v299_v36 }
 0x1ba   :  { %303 = vst [vmem:[#allocation11] sm:$0xff] %v300_v37 }
 0x1bb   :  { %314 = dma.vmem_to_hbm [thread:$0]  %s310_s28, 128, %s312_s8, [#allocation4]  }
 0x1bf   :  { %v301_v38 = vpop.f32.mrf.mxu2 }
 0x1c0   :  { %574 = dma.done.wait [#allocation4], 128  }
 0x1c1   :  { %575 = vsyncadd [#allocation4], 4294967168 }
 0x1c2   :  { %319 = vsyncpa [#allocation3], 1 }
 0x1c3   :  { %320 = vsyncpa [#allocation6], 1 }
 0x1c4   :  { %321 = vsyncpa [#allocation9], 1 }
 0x1c5   :  { %322 = vsyncpa [#allocation4], 1 }

</bundles_post_ra>
